<compile_context>
chip_gen: v7x
topology: tpu7x:2x2x1
jax: 0.10.0
libtpu: 0.0.40
codegen_flags: <defaults>
</compile_context>

<pallas_src>
import jax
import jax.numpy as jnp
from jax.experimental import pallas as pl
from jax.experimental.pallas import tpu as pltpu

INPUT_LENGTH = 64

_LANES = 128                      # vreg lane width; lane-dense last dim
_MIN_GRID_STEPS = 4               # never let the grid collapse to 1 step
_MIN_TILE_ROWS = 512              # 512 x 128 f32 = 256 KiB minimum block
_PALLAS_MIN_ELEMS = 512 * 1024    # ~2 MiB f32; below this XLA's fused -abs wins
_VMEM_LIMIT_BYTES = 48 << 20      # safe on v5e/v6e (128 MiB) and v7x (64 MiB)


def _round_up(v: int, m: int) -> int:
    return ((v + m - 1) // m) * m


def _chip_max_tile_rows() -> int:
    """Per-generation max block size, in rows of 128 lanes (f32)."""
    kind = ""
    try:
        kind = jax.devices()[0].device_kind.lower()
    except Exception:
        pass
    if "v5" in kind:
        return 4096   # 2 MiB blocks (8 MiB live): ~88% amortized vs 0.82 TB/s HBM
    if "v6" in kind:
        return 8192   # 4 MiB blocks (16 MiB live): ~86% of 1.4 TB/s roofline
    if "v7" in kind:
        return 16384  # 8 MiB blocks (32 MiB live): amortize 0.35us/step vs 3.2 TB/s
    return 8192       # unknown chip: middle of the road (scoped limit is raised)


def _luul_kernel(x_ref, o_ref):
    # Hot path: elementwise -|x| on the VPU over one lane-dense block.
    o_ref[...] = -jnp.abs(x_ref[...])


def _luul_pallas_2d(x2d: jax.Array, *, donate_input: bool) -> jax.Array:
    """Run the kernel on a lane-dense [rows, 128] view."""
    rows, lanes = x2d.shape
    max_tile = _chip_max_tile_rows()
    # Cap the tile so the grid has >= ~4 steps: lets the auto double-buffering
    # overlap input/output DMA and lets v7x shard steps across both TCs.
    tile = max(_MIN_TILE_ROWS, _round_up(rows // _MIN_GRID_STEPS, 8))
    tile = min(tile, max_tile, _round_up(rows, 8))
    grid = (pl.cdiv(rows, tile),)

    nbytes = rows * lanes * x2d.dtype.itemsize
    return pl.pallas_call(
        _luul_kernel,
        out_shape=jax.ShapeDtypeStruct((rows, lanes), x2d.dtype),
        grid_spec=pl.GridSpec(
            grid=grid,
            in_specs=[pl.BlockSpec((tile, lanes), lambda i: (i, 0))],
            out_specs=pl.BlockSpec((tile, lanes), lambda i: (i, 0)),
        ),
        input_output_aliases=({0: 0} if donate_input else {}),
        cost_estimate=pl.CostEstimate(
            flops=2 * rows * lanes,
            transcendentals=0,
            bytes_accessed=2 * nbytes,
        ),
        compiler_params=pltpu.CompilerParams(
            dimension_semantics=("parallel",),
            vmem_limit_bytes=_VMEM_LIMIT_BYTES,
        ),
    )(x2d)


def luul_forward(x: jax.Array, *, donate_input: bool = False) -> jax.Array:
    """Pallas equivalent of LUUL.forward: returns -1 * |x|.

    The frozen zero bias of the PyTorch module is never used in forward, so it
    does not participate in the kernel.  Set donate_input=True only when the
    caller donates x's buffer (e.g. jax.jit(..., donate_argnums=0)).
    """
    orig_shape = x.shape
    n = x.size
    if n < _PALLAS_MIN_ELEMS or (n % _LANES) != 0:
        # Small or ragged input: XLA's fused -abs is already at HBM roofline;
        # a pallas_call here would only add launch/per-step overhead (or, for
        # the ragged case, extra pad/slice HBM passes around the kernel).
        return -jnp.abs(x)
    x2d = x.reshape(-1, _LANES)   # free, no-copy lane-dense view
    out2d = _luul_pallas_2d(x2d, donate_input=donate_input)
    return out2d.reshape(orig_shape)


if __name__ == "__main__":
    key = jax.random.PRNGKey(0)
    k_small, k_big, k_odd = jax.random.split(key, 3)

    # Deterministic parameter init (matches torch.zeros(INPUT_LENGTH)); unused
    # in forward, kept here for parity with the module definition.
    bias = jnp.zeros((INPUT_LENGTH,), dtype=jnp.float32)

    # 1) Small input consistent with INPUT_LENGTH=64 -> fused XLA path.
    x_small = jax.random.normal(k_small, (8, INPUT_LENGTH), dtype=jnp.float32)
    out_small = jax.block_until_ready(luul_forward(x_small))
    assert out_small.shape == x_small.shape
    assert jnp.allclose(out_small, -jnp.abs(x_small)), "small-path mismatch"

    # 2) Larger batch -> lane-dense tiled Pallas path (8192*64 = 512K elems,
    #    grid of >= 4 steps, no pad/slice copies).
    x_big = jax.random.normal(k_big, (8192, INPUT_LENGTH), dtype=jnp.float32)
    ref_big = jax.block_until_ready(-jnp.abs(x_big))
    out_big = jax.block_until_ready(luul_forward(x_big))
    assert out_big.shape == x_big.shape
    assert jnp.allclose(out_big, ref_big), "pallas-path mismatch"

    # 3) Donated/jitted variant: input buffer is reused for the output via
    #    input_output_aliases={0: 0} (reference computed beforehand).
    luul_donated = jax.jit(
        lambda t: luul_forward(t, donate_input=True), donate_argnums=0)
    x_donor = x_big + 0.0   # fresh buffer we are allowed to donate
    out_don = jax.block_until_ready(luul_donated(x_donor))
    del x_donor             # donated; must not be used afterwards
    assert jnp.allclose(out_don, ref_big), "donated-path mismatch"

    # 4) Odd batch (255*64 not a multiple of 128) -> roofline XLA fallback,
    #    replacing the old pad + slice HBM round-trip.
    x_odd = jax.random.normal(k_odd, (255, INPUT_LENGTH), dtype=jnp.float32)
    out_odd = jax.block_until_ready(luul_forward(x_odd))
    assert out_odd.shape == x_odd.shape
    assert jnp.allclose(out_odd, -jnp.abs(x_odd)), "ragged-path mismatch"

    print("KERNEL_OK")
</pallas_src>

<mosaic_0001>
module attributes {stable_mosaic.version = 11 : i64} {
  func.func @_luul_kernel(%arg0: i32, %arg1: memref<1024x128xf32, #tpu.memory_space<vmem>>, %arg2: memref<1024x128xf32, #tpu.memory_space<vmem>>) attributes {dimension_semantics = [#tpu.dimension_semantics<parallel>], iteration_bounds = array<i64: 4>, scalar_prefetch = 0 : i64, scratch_operands = 0 : i64, tpu.core_type = #tpu.core_type<tc>, window_params = [{transform_indices = @transform_0, window_bounds = array<i64: 1024, 128>}, {transform_indices = @transform_1, window_bounds = array<i64: 1024, 128>}]} {
    %c0 = arith.constant 0 : index
    %c0_0 = arith.constant 0 : index
    %0 = vector.load %arg1[%c0, %c0_0] : memref<1024x128xf32, #tpu.memory_space<vmem>>, vector<1024x128xf32>
    %1 = math.absf %0 : vector<1024x128xf32>
    %cst = arith.constant 0.000000e+00 : f32
    %2 = vector.broadcast %cst : f32 to vector<1024x128xf32>
    %3 = arith.subf %2, %1 : vector<1024x128xf32>
    %c0_1 = arith.constant 0 : index
    %c0_2 = arith.constant 0 : index
    %4 = vector.load %arg2[%c0_1, %c0_2] : memref<1024x128xf32, #tpu.memory_space<vmem>>, vector<1024x128xf32>
    tpu.vector_store %arg2[%c0_1, %c0_2], %3 {strides = array<i32>} : memref<1024x128xf32, #tpu.memory_space<vmem>>, vector<1024x128xf32>,
    return
  }
  func.func @transform_0(%arg0: i32) -> (i32, i32) {
    %c0_i32 = arith.constant 0 : i32
    %c0_i32_0 = arith.constant 0 : i32
    return %arg0, %c0_i32 : i32, i32
  }
  func.func @transform_1(%arg0: i32) -> (i32, i32) {
    %c0_i32 = arith.constant 0 : i32
    %c0_i32_0 = arith.constant 0 : i32
    return %arg0, %c0_i32 : i32, i32
  }
}

</mosaic_0001>

<bundles_post_ra>
// kernel: tpu_custom_call.1
= control target key start
LH: loop header
LB: loop body
LE: loop exit
PB: predicated region body
PF: predicated region fallthrough
CT: control target
= control target key end

     0   :  { %6 = vsyncpa [#allocation3], 0  ;;  %s1337_s0 = inlined_call_operand.hbm [shape: f32[4096,128], index: 0, kind: input, shape index: {}]   ;;  %s1338_s1 = inlined_call_operand.hbm [shape: f32[4096,128], index: 1, kind: output, shape index: {}]  }
   0x1   :  { %8 = vsyncpa [#allocation3 + $0x1], 0 }
   0x2   :  { %9 = vsyncpa [#allocation4], 0 }
   0x3   :  { %11 = vsyncpa [#allocation4 + $0x1], 0  ;;  %s916_s6 = smov 0   ;;  %s918_s7 = smov 0  }
   0x4   :  { %s920_s8 = smov 0   ;;  %s922_s9 = smov 0  }
   0x5 LB: > { %s937_s10 = sadd.s32 4294967295, %s898_s9   ;;  %s736_s11 = sadd.s32 4294967294, %s898_s9   ;;  %s898_s9 = sphi %s922_s9, %s1350_s9   ;;  %s894_s8 = sphi %s920_s8, %s1349_s8   ;;  %s890_s7 = sphi %s918_s7, %s1348_s7   ;;  %s886_s6 = sphi %s916_s6, %s1347_s6  }
   0x6   : > { %s941_s12 = sadd.s32 1, %s898_s9   ;;  %s24_s13 = sadd.s32 1, %s894_s8 }
   0x7   : > { %s21_s14 = ssub.s32 %s898_s9, %s941_s12  ;;  %p31_p0 = scmp.ne.s32.totalorder %s894_s8, %s890_s7 }
   0x8   : > { %p22_p1 = scmp.eq.s32.totalorder %s21_s14, 0  ;;  %p32_p2 = scmp.eq.s32.totalorder %s898_s9, 0 }
   0x9   : > { %p37_p3 = scmp.ne.s32.totalorder %s890_s7, %s886_s6  ;;  %p38_p4 = scmp.eq.s32.totalorder %s937_s10, 0 }
   0xa   : > { %s953_s15 = scalar_select %p22_p1, %s894_s8, %s24_s13  }
   0xb   : > { %p955_p5 = por %p32_p2, %p31_p0  ;;  %p959_p6 = por %p38_p4, %p37_p3 }
   0xc   : > { %p61_p7 = scmp.eq.s32.totalorder %s937_s10, 3  ;;  %p67_p8 = scmp.eq.s32.totalorder %s736_s11, 3 }
   0xd   : > { %p764_p9 = scmp.lt.s32.totalorder %s898_s9, 4  ;;  %s87_s20 = sand.u32 1, %s894_s8  }
   0xe   : > { %p965_p10 = por %p61_p7, %p31_p0  ;;  %p969_p11 = por %p67_p8, %p37_p3 }
   0xf   : > { %s750_s21 = sshll.u32 %s898_s9, 14  ;;  %s739_s22 = sshll.u32 %s87_s20, 10 }
  0x10   : > { %s1342_s18 = scalar_select %p965_p10, 1, 0 }
  0x11   : > { %s1343_s19 = scalar_select %p969_p11, 1, 0 }
  0x12   : > { %s978_s25 = scalar_lea.hbm %s1337_s0, %s750_s21  ;;  %s91_s26 = scalar_lea.vmem [#allocation2], %s739_s22 }
  0x13   : > { %s98_s27 = sshll.u32 %s91_s26, 4  ;;  %p982_p12 = pnand %p764_p9, %p955_p5  ;;  %s986_s27 = int_to_ptr.vmem [resolvable:$true] %s98_s27 }
  0x14   : > { %s988_s29 = scalar_lea.sflag [#allocation3], %s87_s20  ;;  %s802_s30 = scalar_lea.hbm %s978_s25, 16384 }
  0x15   : > { %p803_p13 = scmp.ne.s32.totalorder %s978_s25, %s802_s30  ;;  %p804_p0 = pneg %p982_p12 }
  0x16   : > { %s807_s4 = scalar_lea.hbm %s1337_s0, 65536  ;;  %p808_p3 = scmp.lt.u32.totalorder %s978_s25, %s1337_s0 }
  0x17   : > { %p805_p1 = pnand %p804_p0, %p803_p13  ;;  %p809_p4 = scmp.lt.u32.totalorder %s807_s4, %s802_s30 }
  0x18   : > { %p811_p7 = scmp.lt.u32.totalorder %s802_s30, %s978_s25 }
  0x19   : > { %p806_p2 = pneg %p805_p1  ;;  %p810_p5 = por %p809_p4, %p808_p3 }
  0x1b   : > { %p812_p8 = por %p811_p7, %p810_p5 }
  0x1d   : > { %p813_p9 = pnand %p812_p8, %p806_p2 }
  0x1f   : > { %816 = shalt.err (!%p813_p9)
}
  0x20   : > { %s817_s13 = scalar_lea.vmem %s986_s27, 16384  ;;  %s900_s14 = smov [#allocation2]  }
  0x21   : > { %p818_p13 = scmp.ne.s32.totalorder %s986_s27, %s817_s13  ;;  %s822_s16 = sshll.u32 %s900_s14, 4  ;;  %s823_s16 = int_to_ptr.vmem [resolvable:$false] %s822_s16 }
  0x22   : > { %s824_s20 = scalar_lea.vmem %s823_s16, 32768  ;;  %p825_p10 = scmp.lt.s32.totalorder %s986_s27, %s823_s16 }
  0x23   : > { %p820_p1 = pnand %p818_p13, %p804_p0  ;;  %p826_p3 = scmp.lt.s32.totalorder %s824_s20, %s817_s13 }
  0x25   : > { %p821_p11 = pneg %p820_p1  ;;  %p827_p4 = por %p826_p3, %p825_p10 }
  0x27   : > { %p828_p5 = pnand %p827_p4, %p821_p11 }
  0x29   : > { %831 = shalt.err (!%p828_p5)
}
  0x2a   : > { %s901_s21 = smov 128   ;;  %s902_s22 = smov 8  }
  0x2b   : > { %759 = dma.hbm_to_vmem [thread:$0]  (!%p982_p12), %s978_s25, 16384, %s986_s27, %s988_s29, %s901_s21, %s901_s21, %s902_s22  }
  0x2c   : > { %p742_p0 = scmp.ge.s32.totalorder %s898_s9, 1  ;;  %p106_p2 = scmp.lt.s32.totalorder %s898_s9, 5 }
  0x2e   : > { %p107_p7 = pnand %p742_p0, %p106_p2 }
  0x2f   : > { %s1019_s23 = sand.u32 (!%p107_p7), 1, %s890_s7  }
  0x30   : > { %110 = sbr.rel (%p107_p7) target bundleno = 186 (0xba), region = 24  ;;  %s743_s24 = sshll.u32 (!%p107_p7), %s1019_s23, 10 }
  0x31   : > { %s113_s26 = scalar_lea.sflag (!%p107_p7), [#allocation3], %s1019_s23  ;;  %s1023_s30 = scalar_lea.vmem (!%p107_p7), [#allocation2], %s743_s24 }
  0x37   : > { %877 = dma.done.wait (%p959_p6), %s113_s26, 16384  }
  0x38   : > { %879 = vsyncadd (%p959_p6), %s113_s26, 4294950912  ;;  %v137_v0 = vld [vmem:[%s1023_s30] sm:$0xff]  ;;  %v138_v1 = vld [vmem:[%s1023_s30 + $0x8] sm:$0xff]  ;;  %s1036_s17 = scalar_lea.vmem [#allocation5], %s743_s24  ;;  %s751_s25 = sshll.u32 %s937_s10, 14 }
  0x39   : > { %v139_v2 = vld [vmem:[%s1023_s30 + $0x10] sm:$0xff]  ;;  %v265_v3 = vand.u32 2147483647, %v137_v0  ;;  %v266_v4 = vand.u32 2147483647, %v138_v1  ;;  %v140_v6 = vld [vmem:[%s1023_s30 + $0x18] sm:$0xff]  ;;  %s1288_s29 = scalar_lea.hbm %s1338_s1, %s751_s25 }
  0x3a   : > { %v267_v5 = vand.u32 2147483647, %v139_v2  ;;  %v141_v7 = vld [vmem:[%s1023_s30 + $0x20] sm:$0xff]  ;;  %v142_v8 = vld [vmem:[%s1023_s30 + $0x28] sm:$0xff]  ;;  %v268_v12 = vand.u32 2147483647, %v140_v6 }
  0x3b   : > { %v393_v9 = vsub.f32 0.0, %v265_v3  ;;  %v394_v10 = vsub.f32 0.0, %v266_v4  ;;  %v143_v13 = vld [vmem:[%s1023_s30 + $0x30] sm:$0xff]  ;;  %v269_v14 = vand.u32 2147483647, %v141_v7  ;;  %v144_v18 = vld [vmem:[%s1023_s30 + $0x38] sm:$0xff] }
  0x3c   : > { %v395_v11 = vsub.f32 0.0, %v267_v5  ;;  %v270_v15 = vand.u32 2147483647, %v142_v8  ;;  %v271_v16 = vand.u32 2147483647, %v143_v13  ;;  %v396_v17 = vsub.f32 0.0, %v268_v12 }
  0x3d   : > { %521 = vst [vmem:[%s1036_s17] sm:$0xff] %v393_v9  ;;  %522 = vst [vmem:[%s1036_s17 + $0x8] sm:$0xff] %v394_v10  ;;  %v145_v19 = vld [vmem:[%s1023_s30 + $0x40] sm:$0xff]  ;;  %v146_v20 = vld [vmem:[%s1023_s30 + $0x48] sm:$0xff]  ;;  %v397_v21 = vsub.f32 0.0, %v269_v14  ;;  %v272_v24 = vand.u32 2147483647, %v144_v18 }
  0x3e   : > { %523 = vst [vmem:[%s1036_s17 + $0x10] sm:$0xff] %v395_v11  ;;  %v398_v22 = vsub.f32 0.0, %v270_v15  ;;  %v399_v23 = vsub.f32 0.0, %v271_v16  ;;  %v147_v25 = vld [vmem:[%s1023_s30 + $0x50] sm:$0xff]  ;;  %524 = vst [vmem:[%s1036_s17 + $0x18] sm:$0xff] %v396_v17  ;;  %v148_v30 = vld [vmem:[%s1023_s30 + $0x58] sm:$0xff] }
  0x3f   : > { %v273_v26 = vand.u32 2147483647, %v145_v19  ;;  %v274_v27 = vand.u32 2147483647, %v146_v20  ;;  %v275_v28 = vand.u32 2147483647, %v147_v25 }
  0x40   : > { %525 = vst [vmem:[%s1036_s17 + $0x20] sm:$0xff] %v397_v21  ;;  %526 = vst [vmem:[%s1036_s17 + $0x28] sm:$0xff] %v398_v22  ;;  %v400_v29 = vsub.f32 0.0, %v272_v24  ;;  %v149_v31 = vld [vmem:[%s1023_s30 + $0x60] sm:$0xff]  ;;  %v150_v32 = vld [vmem:[%s1023_s30 + $0x68] sm:$0xff]  ;;  %s663_s27 = sshll.u32 %s1036_s17, 4  ;;  %s1290_s27 = int_to_ptr.vmem [resolvable:$true] %s663_s27 }
  0x41   : > { %527 = vst [vmem:[%s1036_s17 + $0x30] sm:$0xff] %v399_v23  ;;  %v401_v33 = vsub.f32 0.0, %v273_v26  ;;  %v402_v34 = vsub.f32 0.0, %v274_v27  ;;  %v403_v35 = vsub.f32 0.0, %v275_v28  ;;  %v276_v36 = vand.u32 2147483647, %v148_v30 }
  0x42   : > { %v151_v37 = vld [vmem:[%s1023_s30 + $0x70] sm:$0xff]  ;;  %528 = vst [vmem:[%s1036_s17 + $0x38] sm:$0xff] %v400_v29  ;;  %v277_v38 = vand.u32 2147483647, %v149_v31  ;;  %v278_v39 = vand.u32 2147483647, %v150_v32 }
  0x43   : > { %v279_v40 = vand.u32 2147483647, %v151_v37  ;;  %529 = vst [vmem:[%s1036_s17 + $0x40] sm:$0xff] %v401_v33  ;;  %530 = vst [vmem:[%s1036_s17 + $0x48] sm:$0xff] %v402_v34  ;;  %v404_v41 = vsub.f32 0.0, %v276_v36  ;;  %v152_v42 = vld [vmem:[%s1023_s30 + $0x78] sm:$0xff] }
  0x44   : > { %531 = vst [vmem:[%s1036_s17 + $0x50] sm:$0xff] %v403_v35  ;;  %v153_v43 = vld [vmem:[%s1023_s30 + $0x80] sm:$0xff]  ;;  %v154_v44 = vld [vmem:[%s1023_s30 + $0x88] sm:$0xff]  ;;  %v405_v45 = vsub.f32 0.0, %v277_v38  ;;  %v406_v46 = vsub.f32 0.0, %v278_v39  ;;  %v155_v49 = vld [vmem:[%s1023_s30 + $0x90] sm:$0xff] }
  0x45   : > { %v407_v47 = vsub.f32 0.0, %v279_v40  ;;  %v280_v48 = vand.u32 2147483647, %v152_v42  ;;  %532 = vst [vmem:[%s1036_s17 + $0x58] sm:$0xff] %v404_v41  ;;  %v281_v50 = vand.u32 2147483647, %v153_v43 }
  0x46   : > { %v282_v51 = vand.u32 2147483647, %v154_v44  ;;  %v283_v52 = vand.u32 2147483647, %v155_v49  ;;  %533 = vst [vmem:[%s1036_s17 + $0x60] sm:$0xff] %v405_v45  ;;  %534 = vst [vmem:[%s1036_s17 + $0x68] sm:$0xff] %v406_v46 }
  0x47   : > { %535 = vst [vmem:[%s1036_s17 + $0x70] sm:$0xff] %v407_v47  ;;  %v408_v53 = vsub.f32 0.0, %v280_v48  ;;  %v156_v54 = vld [vmem:[%s1023_s30 + $0x98] sm:$0xff]  ;;  %v157_v55 = vld [vmem:[%s1023_s30 + $0xa0] sm:$0xff]  ;;  %v158_v56 = vld [vmem:[%s1023_s30 + $0xa8] sm:$0xff]  ;;  %v409_v57 = vsub.f32 0.0, %v281_v50 }
  0x48   : > { %v410_v58 = vsub.f32 0.0, %v282_v51  ;;  %v411_v59 = vsub.f32 0.0, %v283_v52  ;;  %v284_v60 = vand.u32 2147483647, %v156_v54  ;;  %v159_v61 = vld [vmem:[%s1023_s30 + $0xb0] sm:$0xff]  ;;  %v160_v2 = vld [vmem:[%s1023_s30 + $0xb8] sm:$0xff] }
  0x49   : > { %536 = vst [vmem:[%s1036_s17 + $0x78] sm:$0xff] %v408_v53  ;;  %v285_v62 = vand.u32 2147483647, %v157_v55  ;;  %v286_v63 = vand.u32 2147483647, %v158_v56  ;;  %537 = vst [vmem:[%s1036_s17 + $0x80] sm:$0xff] %v409_v57 }
  0x4a   : > { %v287_v0 = vand.u32 2147483647, %v159_v61  ;;  %538 = vst [vmem:[%s1036_s17 + $0x88] sm:$0xff] %v410_v58  ;;  %539 = vst [vmem:[%s1036_s17 + $0x90] sm:$0xff] %v411_v59  ;;  %v412_v1 = vsub.f32 0.0, %v284_v60  ;;  %v161_v3 = vld [vmem:[%s1023_s30 + $0xc0] sm:$0xff] }
  0x4b   : > { %v162_v4 = vld [vmem:[%s1023_s30 + $0xc8] sm:$0xff]  ;;  %v413_v5 = vsub.f32 0.0, %v285_v62  ;;  %v414_v6 = vsub.f32 0.0, %v286_v63  ;;  %v288_v8 = vand.u32 2147483647, %v160_v2  ;;  %v163_v9 = vld [vmem:[%s1023_s30 + $0xd0] sm:$0xff] }
  0x4c   : > { %v415_v7 = vsub.f32 0.0, %v287_v0  ;;  %540 = vst [vmem:[%s1036_s17 + $0x98] sm:$0xff] %v412_v1  ;;  %v289_v10 = vand.u32 2147483647, %v161_v3  ;;  %v290_v11 = vand.u32 2147483647, %v162_v4 }
  0x4d   : > { %v291_v12 = vand.u32 2147483647, %v163_v9  ;;  %541 = vst [vmem:[%s1036_s17 + $0xa0] sm:$0xff] %v413_v5  ;;  %542 = vst [vmem:[%s1036_s17 + $0xa8] sm:$0xff] %v414_v6  ;;  %v416_v13 = vsub.f32 0.0, %v288_v8  ;;  %v164_v14 = vld [vmem:[%s1023_s30 + $0xd8] sm:$0xff] }
  0x4e   : > { %543 = vst [vmem:[%s1036_s17 + $0xb0] sm:$0xff] %v415_v7  ;;  %v165_v15 = vld [vmem:[%s1023_s30 + $0xe0] sm:$0xff]  ;;  %v166_v16 = vld [vmem:[%s1023_s30 + $0xe8] sm:$0xff]  ;;  %v417_v17 = vsub.f32 0.0, %v289_v10  ;;  %v418_v18 = vsub.f32 0.0, %v290_v11  ;;  %v167_v21 = vld [vmem:[%s1023_s30 + $0xf0] sm:$0xff] }
  0x4f   : > { %v419_v19 = vsub.f32 0.0, %v291_v12  ;;  %v292_v20 = vand.u32 2147483647, %v164_v14  ;;  %544 = vst [vmem:[%s1036_s17 + $0xb8] sm:$0xff] %v416_v13  ;;  %v293_v22 = vand.u32 2147483647, %v165_v15 }
  0x50   : > { %v294_v23 = vand.u32 2147483647, %v166_v16  ;;  %v295_v24 = vand.u32 2147483647, %v167_v21  ;;  %545 = vst [vmem:[%s1036_s17 + $0xc0] sm:$0xff] %v417_v17  ;;  %546 = vst [vmem:[%s1036_s17 + $0xc8] sm:$0xff] %v418_v18 }
  0x51   : > { %547 = vst [vmem:[%s1036_s17 + $0xd0] sm:$0xff] %v419_v19  ;;  %v420_v25 = vsub.f32 0.0, %v292_v20  ;;  %v168_v26 = vld [vmem:[%s1023_s30 + $0xf8] sm:$0xff]  ;;  %v169_v27 = vld [vmem:[%s1023_s30 + $0x100] sm:$0xff]  ;;  %v170_v28 = vld [vmem:[%s1023_s30 + $0x108] sm:$0xff]  ;;  %v421_v29 = vsub.f32 0.0, %v293_v22 }
  0x52   : > { %v422_v30 = vsub.f32 0.0, %v294_v23  ;;  %v423_v31 = vsub.f32 0.0, %v295_v24  ;;  %v296_v32 = vand.u32 2147483647, %v168_v26  ;;  %v171_v33 = vld [vmem:[%s1023_s30 + $0x110] sm:$0xff]  ;;  %v172_v38 = vld [vmem:[%s1023_s30 + $0x118] sm:$0xff] }
  0x53   : > { %548 = vst [vmem:[%s1036_s17 + $0xd8] sm:$0xff] %v420_v25  ;;  %v297_v34 = vand.u32 2147483647, %v169_v27  ;;  %v298_v35 = vand.u32 2147483647, %v170_v28  ;;  %549 = vst [vmem:[%s1036_s17 + $0xe0] sm:$0xff] %v421_v29 }
  0x54   : > { %v299_v36 = vand.u32 2147483647, %v171_v33  ;;  %550 = vst [vmem:[%s1036_s17 + $0xe8] sm:$0xff] %v422_v30  ;;  %551 = vst [vmem:[%s1036_s17 + $0xf0] sm:$0xff] %v423_v31  ;;  %v424_v37 = vsub.f32 0.0, %v296_v32  ;;  %v173_v39 = vld [vmem:[%s1023_s30 + $0x120] sm:$0xff] }
  0x55   : > { %v174_v40 = vld [vmem:[%s1023_s30 + $0x128] sm:$0xff]  ;;  %v425_v41 = vsub.f32 0.0, %v297_v34  ;;  %v426_v42 = vsub.f32 0.0, %v298_v35  ;;  %v300_v44 = vand.u32 2147483647, %v172_v38  ;;  %v175_v45 = vld [vmem:[%s1023_s30 + $0x130] sm:$0xff] }
  0x56   : > { %v427_v43 = vsub.f32 0.0, %v299_v36  ;;  %552 = vst [vmem:[%s1036_s17 + $0xf8] sm:$0xff] %v424_v37  ;;  %v301_v46 = vand.u32 2147483647, %v173_v39  ;;  %v302_v47 = vand.u32 2147483647, %v174_v40 }
  0x57   : > { %v303_v48 = vand.u32 2147483647, %v175_v45  ;;  %553 = vst [vmem:[%s1036_s17 + $0x100] sm:$0xff] %v425_v41  ;;  %554 = vst [vmem:[%s1036_s17 + $0x108] sm:$0xff] %v426_v42  ;;  %v428_v49 = vsub.f32 0.0, %v300_v44  ;;  %v176_v50 = vld [vmem:[%s1023_s30 + $0x138] sm:$0xff] }
  0x58   : > { %555 = vst [vmem:[%s1036_s17 + $0x110] sm:$0xff] %v427_v43  ;;  %v177_v51 = vld [vmem:[%s1023_s30 + $0x140] sm:$0xff]  ;;  %v178_v52 = vld [vmem:[%s1023_s30 + $0x148] sm:$0xff]  ;;  %v429_v53 = vsub.f32 0.0, %v301_v46  ;;  %v430_v54 = vsub.f32 0.0, %v302_v47  ;;  %v179_v57 = vld [vmem:[%s1023_s30 + $0x150] sm:$0xff] }
  0x59   : > { %v431_v55 = vsub.f32 0.0, %v303_v48  ;;  %v304_v56 = vand.u32 2147483647, %v176_v50  ;;  %556 = vst [vmem:[%s1036_s17 + $0x118] sm:$0xff] %v428_v49  ;;  %v305_v58 = vand.u32 2147483647, %v177_v51 }
  0x5a   : > { %v306_v59 = vand.u32 2147483647, %v178_v52  ;;  %v307_v60 = vand.u32 2147483647, %v179_v57  ;;  %557 = vst [vmem:[%s1036_s17 + $0x120] sm:$0xff] %v429_v53  ;;  %558 = vst [vmem:[%s1036_s17 + $0x128] sm:$0xff] %v430_v54 }
  0x5b   : > { %559 = vst [vmem:[%s1036_s17 + $0x130] sm:$0xff] %v431_v55  ;;  %v432_v61 = vsub.f32 0.0, %v304_v56  ;;  %v180_v62 = vld [vmem:[%s1023_s30 + $0x158] sm:$0xff]  ;;  %v181_v63 = vld [vmem:[%s1023_s30 + $0x160] sm:$0xff]  ;;  %v182_v0 = vld [vmem:[%s1023_s30 + $0x168] sm:$0xff]  ;;  %v433_v1 = vsub.f32 0.0, %v305_v58 }
  0x5c   : > { %v434_v2 = vsub.f32 0.0, %v306_v59  ;;  %v435_v3 = vsub.f32 0.0, %v307_v60  ;;  %v308_v4 = vand.u32 2147483647, %v180_v62  ;;  %v183_v5 = vld [vmem:[%s1023_s30 + $0x170] sm:$0xff]  ;;  %v184_v10 = vld [vmem:[%s1023_s30 + $0x178] sm:$0xff] }
  0x5d   : > { %560 = vst [vmem:[%s1036_s17 + $0x138] sm:$0xff] %v432_v61  ;;  %v309_v6 = vand.u32 2147483647, %v181_v63  ;;  %v310_v7 = vand.u32 2147483647, %v182_v0  ;;  %561 = vst [vmem:[%s1036_s17 + $0x140] sm:$0xff] %v433_v1 }
  0x5e   : > { %v311_v8 = vand.u32 2147483647, %v183_v5  ;;  %562 = vst [vmem:[%s1036_s17 + $0x148] sm:$0xff] %v434_v2  ;;  %563 = vst [vmem:[%s1036_s17 + $0x150] sm:$0xff] %v435_v3  ;;  %v436_v9 = vsub.f32 0.0, %v308_v4  ;;  %v185_v11 = vld [vmem:[%s1023_s30 + $0x180] sm:$0xff] }
  0x5f   : > { %v186_v12 = vld [vmem:[%s1023_s30 + $0x188] sm:$0xff]  ;;  %v437_v13 = vsub.f32 0.0, %v309_v6  ;;  %v438_v14 = vsub.f32 0.0, %v310_v7  ;;  %v312_v16 = vand.u32 2147483647, %v184_v10  ;;  %v187_v17 = vld [vmem:[%s1023_s30 + $0x190] sm:$0xff] }
  0x60   : > { %v439_v15 = vsub.f32 0.0, %v311_v8  ;;  %564 = vst [vmem:[%s1036_s17 + $0x158] sm:$0xff] %v436_v9  ;;  %v313_v18 = vand.u32 2147483647, %v185_v11  ;;  %v314_v19 = vand.u32 2147483647, %v186_v12 }
  0x61   : > { %v315_v20 = vand.u32 2147483647, %v187_v17  ;;  %565 = vst [vmem:[%s1036_s17 + $0x160] sm:$0xff] %v437_v13  ;;  %566 = vst [vmem:[%s1036_s17 + $0x168] sm:$0xff] %v438_v14  ;;  %v440_v21 = vsub.f32 0.0, %v312_v16  ;;  %v188_v22 = vld [vmem:[%s1023_s30 + $0x198] sm:$0xff] }
  0x62   : > { %567 = vst [vmem:[%s1036_s17 + $0x170] sm:$0xff] %v439_v15  ;;  %v189_v23 = vld [vmem:[%s1023_s30 + $0x1a0] sm:$0xff]  ;;  %v190_v24 = vld [vmem:[%s1023_s30 + $0x1a8] sm:$0xff]  ;;  %v441_v25 = vsub.f32 0.0, %v313_v18  ;;  %v442_v26 = vsub.f32 0.0, %v314_v19  ;;  %v191_v29 = vld [vmem:[%s1023_s30 + $0x1b0] sm:$0xff] }
  0x63   : > { %v443_v27 = vsub.f32 0.0, %v315_v20  ;;  %v316_v28 = vand.u32 2147483647, %v188_v22  ;;  %568 = vst [vmem:[%s1036_s17 + $0x178] sm:$0xff] %v440_v21  ;;  %v317_v30 = vand.u32 2147483647, %v189_v23 }
  0x64   : > { %v318_v31 = vand.u32 2147483647, %v190_v24  ;;  %v319_v32 = vand.u32 2147483647, %v191_v29  ;;  %569 = vst [vmem:[%s1036_s17 + $0x180] sm:$0xff] %v441_v25  ;;  %570 = vst [vmem:[%s1036_s17 + $0x188] sm:$0xff] %v442_v26 }
  0x65   : > { %571 = vst [vmem:[%s1036_s17 + $0x190] sm:$0xff] %v443_v27  ;;  %v444_v33 = vsub.f32 0.0, %v316_v28  ;;  %v192_v34 = vld [vmem:[%s1023_s30 + $0x1b8] sm:$0xff]  ;;  %v193_v35 = vld [vmem:[%s1023_s30 + $0x1c0] sm:$0xff]  ;;  %v194_v36 = vld [vmem:[%s1023_s30 + $0x1c8] sm:$0xff]  ;;  %v445_v37 = vsub.f32 0.0, %v317_v30 }
  0x66   : > { %v446_v38 = vsub.f32 0.0, %v318_v31  ;;  %v447_v39 = vsub.f32 0.0, %v319_v32  ;;  %v320_v40 = vand.u32 2147483647, %v192_v34  ;;  %v195_v41 = vld [vmem:[%s1023_s30 + $0x1d0] sm:$0xff]  ;;  %v196_v46 = vld [vmem:[%s1023_s30 + $0x1d8] sm:$0xff] }
  0x67   : > { %572 = vst [vmem:[%s1036_s17 + $0x198] sm:$0xff] %v444_v33  ;;  %v321_v42 = vand.u32 2147483647, %v193_v35  ;;  %v322_v43 = vand.u32 2147483647, %v194_v36  ;;  %573 = vst [vmem:[%s1036_s17 + $0x1a0] sm:$0xff] %v445_v37 }
  0x68   : > { %v323_v44 = vand.u32 2147483647, %v195_v41  ;;  %574 = vst [vmem:[%s1036_s17 + $0x1a8] sm:$0xff] %v446_v38  ;;  %575 = vst [vmem:[%s1036_s17 + $0x1b0] sm:$0xff] %v447_v39  ;;  %v448_v45 = vsub.f32 0.0, %v320_v40  ;;  %v197_v47 = vld [vmem:[%s1023_s30 + $0x1e0] sm:$0xff] }
  0x69   : > { %v198_v48 = vld [vmem:[%s1023_s30 + $0x1e8] sm:$0xff]  ;;  %v449_v49 = vsub.f32 0.0, %v321_v42  ;;  %v450_v50 = vsub.f32 0.0, %v322_v43  ;;  %v324_v52 = vand.u32 2147483647, %v196_v46  ;;  %v199_v53 = vld [vmem:[%s1023_s30 + $0x1f0] sm:$0xff] }
  0x6a   : > { %v451_v51 = vsub.f32 0.0, %v323_v44  ;;  %576 = vst [vmem:[%s1036_s17 + $0x1b8] sm:$0xff] %v448_v45  ;;  %v325_v54 = vand.u32 2147483647, %v197_v47  ;;  %v326_v55 = vand.u32 2147483647, %v198_v48 }
  0x6b   : > { %v327_v56 = vand.u32 2147483647, %v199_v53  ;;  %577 = vst [vmem:[%s1036_s17 + $0x1c0] sm:$0xff] %v449_v49  ;;  %578 = vst [vmem:[%s1036_s17 + $0x1c8] sm:$0xff] %v450_v50  ;;  %v452_v57 = vsub.f32 0.0, %v324_v52  ;;  %v200_v58 = vld [vmem:[%s1023_s30 + $0x1f8] sm:$0xff] }
  0x6c   : > { %579 = vst [vmem:[%s1036_s17 + $0x1d0] sm:$0xff] %v451_v51  ;;  %v201_v59 = vld [vmem:[%s1023_s30 + $0x200] sm:$0xff]  ;;  %v202_v60 = vld [vmem:[%s1023_s30 + $0x208] sm:$0xff]  ;;  %v453_v61 = vsub.f32 0.0, %v325_v54  ;;  %v454_v62 = vsub.f32 0.0, %v326_v55  ;;  %v203_v1 = vld [vmem:[%s1023_s30 + $0x210] sm:$0xff] }
  0x6d   : > { %v455_v63 = vsub.f32 0.0, %v327_v56  ;;  %v328_v0 = vand.u32 2147483647, %v200_v58  ;;  %580 = vst [vmem:[%s1036_s17 + $0x1d8] sm:$0xff] %v452_v57  ;;  %v329_v2 = vand.u32 2147483647, %v201_v59 }
  0x6e   : > { %v330_v3 = vand.u32 2147483647, %v202_v60  ;;  %v331_v4 = vand.u32 2147483647, %v203_v1  ;;  %581 = vst [vmem:[%s1036_s17 + $0x1e0] sm:$0xff] %v453_v61  ;;  %582 = vst [vmem:[%s1036_s17 + $0x1e8] sm:$0xff] %v454_v62 }
  0x6f   : > { %583 = vst [vmem:[%s1036_s17 + $0x1f0] sm:$0xff] %v455_v63  ;;  %v456_v5 = vsub.f32 0.0, %v328_v0  ;;  %v204_v6 = vld [vmem:[%s1023_s30 + $0x218] sm:$0xff]  ;;  %v205_v7 = vld [vmem:[%s1023_s30 + $0x220] sm:$0xff]  ;;  %v206_v8 = vld [vmem:[%s1023_s30 + $0x228] sm:$0xff]  ;;  %v457_v9 = vsub.f32 0.0, %v329_v2 }
  0x70   : > { %v458_v10 = vsub.f32 0.0, %v330_v3  ;;  %v459_v11 = vsub.f32 0.0, %v331_v4  ;;  %v332_v12 = vand.u32 2147483647, %v204_v6  ;;  %v207_v13 = vld [vmem:[%s1023_s30 + $0x230] sm:$0xff]  ;;  %v208_v18 = vld [vmem:[%s1023_s30 + $0x238] sm:$0xff] }
  0x71   : > { %584 = vst [vmem:[%s1036_s17 + $0x1f8] sm:$0xff] %v456_v5  ;;  %v333_v14 = vand.u32 2147483647, %v205_v7  ;;  %v334_v15 = vand.u32 2147483647, %v206_v8  ;;  %585 = vst [vmem:[%s1036_s17 + $0x200] sm:$0xff] %v457_v9 }
  0x72   : > { %v335_v16 = vand.u32 2147483647, %v207_v13  ;;  %586 = vst [vmem:[%s1036_s17 + $0x208] sm:$0xff] %v458_v10  ;;  %587 = vst [vmem:[%s1036_s17 + $0x210] sm:$0xff] %v459_v11  ;;  %v460_v17 = vsub.f32 0.0, %v332_v12  ;;  %v209_v19 = vld [vmem:[%s1023_s30 + $0x240] sm:$0xff] }
  0x73   : > { %v210_v20 = vld [vmem:[%s1023_s30 + $0x248] sm:$0xff]  ;;  %v461_v21 = vsub.f32 0.0, %v333_v14  ;;  %v462_v22 = vsub.f32 0.0, %v334_v15  ;;  %v336_v24 = vand.u32 2147483647, %v208_v18  ;;  %v211_v25 = vld [vmem:[%s1023_s30 + $0x250] sm:$0xff] }
  0x74   : > { %v463_v23 = vsub.f32 0.0, %v335_v16  ;;  %588 = vst [vmem:[%s1036_s17 + $0x218] sm:$0xff] %v460_v17  ;;  %v337_v26 = vand.u32 2147483647, %v209_v19  ;;  %v338_v27 = vand.u32 2147483647, %v210_v20 }
  0x75   : > { %v339_v28 = vand.u32 2147483647, %v211_v25  ;;  %589 = vst [vmem:[%s1036_s17 + $0x220] sm:$0xff] %v461_v21  ;;  %590 = vst [vmem:[%s1036_s17 + $0x228] sm:$0xff] %v462_v22  ;;  %v464_v29 = vsub.f32 0.0, %v336_v24  ;;  %v212_v30 = vld [vmem:[%s1023_s30 + $0x258] sm:$0xff] }
  0x76   : > { %591 = vst [vmem:[%s1036_s17 + $0x230] sm:$0xff] %v463_v23  ;;  %v213_v31 = vld [vmem:[%s1023_s30 + $0x260] sm:$0xff]  ;;  %v214_v32 = vld [vmem:[%s1023_s30 + $0x268] sm:$0xff]  ;;  %v465_v33 = vsub.f32 0.0, %v337_v26  ;;  %v466_v34 = vsub.f32 0.0, %v338_v27  ;;  %v215_v37 = vld [vmem:[%s1023_s30 + $0x270] sm:$0xff] }
  0x77   : > { %v467_v35 = vsub.f32 0.0, %v339_v28  ;;  %v340_v36 = vand.u32 2147483647, %v212_v30  ;;  %592 = vst [vmem:[%s1036_s17 + $0x238] sm:$0xff] %v464_v29  ;;  %v341_v38 = vand.u32 2147483647, %v213_v31 }
  0x78   : > { %v342_v39 = vand.u32 2147483647, %v214_v32  ;;  %v343_v40 = vand.u32 2147483647, %v215_v37  ;;  %593 = vst [vmem:[%s1036_s17 + $0x240] sm:$0xff] %v465_v33  ;;  %594 = vst [vmem:[%s1036_s17 + $0x248] sm:$0xff] %v466_v34 }
  0x79   : > { %595 = vst [vmem:[%s1036_s17 + $0x250] sm:$0xff] %v467_v35  ;;  %v468_v41 = vsub.f32 0.0, %v340_v36  ;;  %v216_v42 = vld [vmem:[%s1023_s30 + $0x278] sm:$0xff]  ;;  %v217_v43 = vld [vmem:[%s1023_s30 + $0x280] sm:$0xff]  ;;  %v218_v44 = vld [vmem:[%s1023_s30 + $0x288] sm:$0xff]  ;;  %v469_v45 = vsub.f32 0.0, %v341_v38 }
  0x7a   : > { %v470_v46 = vsub.f32 0.0, %v342_v39  ;;  %v471_v47 = vsub.f32 0.0, %v343_v40  ;;  %v344_v48 = vand.u32 2147483647, %v216_v42  ;;  %v219_v49 = vld [vmem:[%s1023_s30 + $0x290] sm:$0xff]  ;;  %v220_v54 = vld [vmem:[%s1023_s30 + $0x298] sm:$0xff] }
  0x7b   : > { %596 = vst [vmem:[%s1036_s17 + $0x258] sm:$0xff] %v468_v41  ;;  %v345_v50 = vand.u32 2147483647, %v217_v43  ;;  %v346_v51 = vand.u32 2147483647, %v218_v44  ;;  %597 = vst [vmem:[%s1036_s17 + $0x260] sm:$0xff] %v469_v45 }
  0x7c   : > { %v347_v52 = vand.u32 2147483647, %v219_v49  ;;  %598 = vst [vmem:[%s1036_s17 + $0x268] sm:$0xff] %v470_v46  ;;  %599 = vst [vmem:[%s1036_s17 + $0x270] sm:$0xff] %v471_v47  ;;  %v472_v53 = vsub.f32 0.0, %v344_v48  ;;  %v221_v55 = vld [vmem:[%s1023_s30 + $0x2a0] sm:$0xff] }
  0x7d   : > { %v222_v56 = vld [vmem:[%s1023_s30 + $0x2a8] sm:$0xff]  ;;  %v473_v57 = vsub.f32 0.0, %v345_v50  ;;  %v474_v58 = vsub.f32 0.0, %v346_v51  ;;  %v348_v60 = vand.u32 2147483647, %v220_v54  ;;  %v223_v61 = vld [vmem:[%s1023_s30 + $0x2b0] sm:$0xff] }
  0x7e   : > { %v475_v59 = vsub.f32 0.0, %v347_v52  ;;  %600 = vst [vmem:[%s1036_s17 + $0x278] sm:$0xff] %v472_v53  ;;  %v349_v62 = vand.u32 2147483647, %v221_v55  ;;  %v350_v63 = vand.u32 2147483647, %v222_v56 }
  0x7f   : > { %v351_v0 = vand.u32 2147483647, %v223_v61  ;;  %601 = vst [vmem:[%s1036_s17 + $0x280] sm:$0xff] %v473_v57  ;;  %602 = vst [vmem:[%s1036_s17 + $0x288] sm:$0xff] %v474_v58  ;;  %v476_v1 = vsub.f32 0.0, %v348_v60  ;;  %v224_v2 = vld [vmem:[%s1023_s30 + $0x2b8] sm:$0xff] }
  0x80   : > { %603 = vst [vmem:[%s1036_s17 + $0x290] sm:$0xff] %v475_v59  ;;  %v225_v3 = vld [vmem:[%s1023_s30 + $0x2c0] sm:$0xff]  ;;  %v226_v4 = vld [vmem:[%s1023_s30 + $0x2c8] sm:$0xff]  ;;  %v477_v5 = vsub.f32 0.0, %v349_v62  ;;  %v478_v6 = vsub.f32 0.0, %v350_v63  ;;  %v227_v9 = vld [vmem:[%s1023_s30 + $0x2d0] sm:$0xff] }
  0x81   : > { %v479_v7 = vsub.f32 0.0, %v351_v0  ;;  %v352_v8 = vand.u32 2147483647, %v224_v2  ;;  %604 = vst [vmem:[%s1036_s17 + $0x298] sm:$0xff] %v476_v1  ;;  %v353_v10 = vand.u32 2147483647, %v225_v3 }
  0x82   : > { %v354_v11 = vand.u32 2147483647, %v226_v4  ;;  %v355_v12 = vand.u32 2147483647, %v227_v9  ;;  %605 = vst [vmem:[%s1036_s17 + $0x2a0] sm:$0xff] %v477_v5  ;;  %606 = vst [vmem:[%s1036_s17 + $0x2a8] sm:$0xff] %v478_v6 }
  0x83   : > { %607 = vst [vmem:[%s1036_s17 + $0x2b0] sm:$0xff] %v479_v7  ;;  %v480_v13 = vsub.f32 0.0, %v352_v8  ;;  %v228_v14 = vld [vmem:[%s1023_s30 + $0x2d8] sm:$0xff]  ;;  %v229_v15 = vld [vmem:[%s1023_s30 + $0x2e0] sm:$0xff]  ;;  %v230_v16 = vld [vmem:[%s1023_s30 + $0x2e8] sm:$0xff]  ;;  %v481_v17 = vsub.f32 0.0, %v353_v10 }
  0x84   : > { %v482_v18 = vsub.f32 0.0, %v354_v11  ;;  %v483_v19 = vsub.f32 0.0, %v355_v12  ;;  %v356_v20 = vand.u32 2147483647, %v228_v14  ;;  %v231_v21 = vld [vmem:[%s1023_s30 + $0x2f0] sm:$0xff]  ;;  %v232_v26 = vld [vmem:[%s1023_s30 + $0x2f8] sm:$0xff] }
  0x85   : > { %608 = vst [vmem:[%s1036_s17 + $0x2b8] sm:$0xff] %v480_v13  ;;  %v357_v22 = vand.u32 2147483647, %v229_v15  ;;  %v358_v23 = vand.u32 2147483647, %v230_v16  ;;  %609 = vst [vmem:[%s1036_s17 + $0x2c0] sm:$0xff] %v481_v17 }
  0x86   : > { %v359_v24 = vand.u32 2147483647, %v231_v21  ;;  %610 = vst [vmem:[%s1036_s17 + $0x2c8] sm:$0xff] %v482_v18  ;;  %611 = vst [vmem:[%s1036_s17 + $0x2d0] sm:$0xff] %v483_v19  ;;  %v484_v25 = vsub.f32 0.0, %v356_v20  ;;  %v233_v27 = vld [vmem:[%s1023_s30 + $0x300] sm:$0xff] }
  0x87   : > { %v234_v28 = vld [vmem:[%s1023_s30 + $0x308] sm:$0xff]  ;;  %v485_v29 = vsub.f32 0.0, %v357_v22  ;;  %v486_v30 = vsub.f32 0.0, %v358_v23  ;;  %v360_v32 = vand.u32 2147483647, %v232_v26  ;;  %v235_v33 = vld [vmem:[%s1023_s30 + $0x310] sm:$0xff] }
  0x88   : > { %v487_v31 = vsub.f32 0.0, %v359_v24  ;;  %612 = vst [vmem:[%s1036_s17 + $0x2d8] sm:$0xff] %v484_v25  ;;  %v361_v34 = vand.u32 2147483647, %v233_v27  ;;  %v362_v35 = vand.u32 2147483647, %v234_v28 }
  0x89   : > { %v363_v36 = vand.u32 2147483647, %v235_v33  ;;  %613 = vst [vmem:[%s1036_s17 + $0x2e0] sm:$0xff] %v485_v29  ;;  %614 = vst [vmem:[%s1036_s17 + $0x2e8] sm:$0xff] %v486_v30  ;;  %v488_v37 = vsub.f32 0.0, %v360_v32  ;;  %v236_v38 = vld [vmem:[%s1023_s30 + $0x318] sm:$0xff] }
  0x8a   : > { %615 = vst [vmem:[%s1036_s17 + $0x2f0] sm:$0xff] %v487_v31  ;;  %v237_v39 = vld [vmem:[%s1023_s30 + $0x320] sm:$0xff]  ;;  %v238_v40 = vld [vmem:[%s1023_s30 + $0x328] sm:$0xff]  ;;  %v489_v41 = vsub.f32 0.0, %v361_v34  ;;  %v490_v42 = vsub.f32 0.0, %v362_v35  ;;  %v239_v45 = vld [vmem:[%s1023_s30 + $0x330] sm:$0xff] }
  0x8b   : > { %v491_v43 = vsub.f32 0.0, %v363_v36  ;;  %v364_v44 = vand.u32 2147483647, %v236_v38  ;;  %616 = vst [vmem:[%s1036_s17 + $0x2f8] sm:$0xff] %v488_v37  ;;  %v365_v46 = vand.u32 2147483647, %v237_v39 }
  0x8c   : > { %v366_v47 = vand.u32 2147483647, %v238_v40  ;;  %v367_v48 = vand.u32 2147483647, %v239_v45  ;;  %617 = vst [vmem:[%s1036_s17 + $0x300] sm:$0xff] %v489_v41  ;;  %618 = vst [vmem:[%s1036_s17 + $0x308] sm:$0xff] %v490_v42 }
  0x8d   : > { %619 = vst [vmem:[%s1036_s17 + $0x310] sm:$0xff] %v491_v43  ;;  %v492_v49 = vsub.f32 0.0, %v364_v44  ;;  %v240_v50 = vld [vmem:[%s1023_s30 + $0x338] sm:$0xff]  ;;  %v241_v51 = vld [vmem:[%s1023_s30 + $0x340] sm:$0xff]  ;;  %v242_v52 = vld [vmem:[%s1023_s30 + $0x348] sm:$0xff]  ;;  %v493_v53 = vsub.f32 0.0, %v365_v46 }
  0x8e   : > { %v494_v54 = vsub.f32 0.0, %v366_v47  ;;  %v495_v55 = vsub.f32 0.0, %v367_v48  ;;  %v368_v56 = vand.u32 2147483647, %v240_v50  ;;  %v243_v57 = vld [vmem:[%s1023_s30 + $0x350] sm:$0xff]  ;;  %v244_v62 = vld [vmem:[%s1023_s30 + $0x358] sm:$0xff] }
  0x8f   : > { %620 = vst [vmem:[%s1036_s17 + $0x318] sm:$0xff] %v492_v49  ;;  %v369_v58 = vand.u32 2147483647, %v241_v51  ;;  %v370_v59 = vand.u32 2147483647, %v242_v52  ;;  %621 = vst [vmem:[%s1036_s17 + $0x320] sm:$0xff] %v493_v53 }
  0x90   : > { %v371_v60 = vand.u32 2147483647, %v243_v57  ;;  %622 = vst [vmem:[%s1036_s17 + $0x328] sm:$0xff] %v494_v54  ;;  %623 = vst [vmem:[%s1036_s17 + $0x330] sm:$0xff] %v495_v55  ;;  %v496_v61 = vsub.f32 0.0, %v368_v56  ;;  %v245_v63 = vld [vmem:[%s1023_s30 + $0x360] sm:$0xff] }
  0x91   : > { %v246_v0 = vld [vmem:[%s1023_s30 + $0x368] sm:$0xff]  ;;  %v497_v1 = vsub.f32 0.0, %v369_v58  ;;  %v498_v2 = vsub.f32 0.0, %v370_v59  ;;  %v372_v4 = vand.u32 2147483647, %v244_v62  ;;  %v247_v5 = vld [vmem:[%s1023_s30 + $0x370] sm:$0xff] }
  0x92   : > { %v499_v3 = vsub.f32 0.0, %v371_v60  ;;  %624 = vst [vmem:[%s1036_s17 + $0x338] sm:$0xff] %v496_v61  ;;  %v373_v6 = vand.u32 2147483647, %v245_v63  ;;  %v374_v7 = vand.u32 2147483647, %v246_v0 }
  0x93   : > { %v375_v8 = vand.u32 2147483647, %v247_v5  ;;  %625 = vst [vmem:[%s1036_s17 + $0x340] sm:$0xff] %v497_v1  ;;  %626 = vst [vmem:[%s1036_s17 + $0x348] sm:$0xff] %v498_v2  ;;  %v500_v9 = vsub.f32 0.0, %v372_v4  ;;  %v248_v10 = vld [vmem:[%s1023_s30 + $0x378] sm:$0xff] }
  0x94   : > { %627 = vst [vmem:[%s1036_s17 + $0x350] sm:$0xff] %v499_v3  ;;  %v249_v11 = vld [vmem:[%s1023_s30 + $0x380] sm:$0xff]  ;;  %v250_v12 = vld [vmem:[%s1023_s30 + $0x388] sm:$0xff]  ;;  %v501_v13 = vsub.f32 0.0, %v373_v6  ;;  %v502_v14 = vsub.f32 0.0, %v374_v7  ;;  %v251_v17 = vld [vmem:[%s1023_s30 + $0x390] sm:$0xff] }
  0x95   : > { %v503_v15 = vsub.f32 0.0, %v375_v8  ;;  %v376_v16 = vand.u32 2147483647, %v248_v10  ;;  %628 = vst [vmem:[%s1036_s17 + $0x358] sm:$0xff] %v500_v9  ;;  %v377_v18 = vand.u32 2147483647, %v249_v11 }
  0x96   : > { %v378_v19 = vand.u32 2147483647, %v250_v12  ;;  %v379_v20 = vand.u32 2147483647, %v251_v17  ;;  %629 = vst [vmem:[%s1036_s17 + $0x360] sm:$0xff] %v501_v13  ;;  %630 = vst [vmem:[%s1036_s17 + $0x368] sm:$0xff] %v502_v14 }
  0x97   : > { %631 = vst [vmem:[%s1036_s17 + $0x370] sm:$0xff] %v503_v15  ;;  %v504_v21 = vsub.f32 0.0, %v376_v16  ;;  %v252_v22 = vld [vmem:[%s1023_s30 + $0x398] sm:$0xff]  ;;  %v253_v23 = vld [vmem:[%s1023_s30 + $0x3a0] sm:$0xff]  ;;  %v254_v24 = vld [vmem:[%s1023_s30 + $0x3a8] sm:$0xff]  ;;  %v505_v25 = vsub.f32 0.0, %v377_v18 }
  0x98   : > { %v506_v26 = vsub.f32 0.0, %v378_v19  ;;  %v507_v27 = vsub.f32 0.0, %v379_v20  ;;  %v380_v28 = vand.u32 2147483647, %v252_v22  ;;  %v255_v29 = vld [vmem:[%s1023_s30 + $0x3b0] sm:$0xff]  ;;  %v256_v34 = vld [vmem:[%s1023_s30 + $0x3b8] sm:$0xff] }
  0x99   : > { %632 = vst [vmem:[%s1036_s17 + $0x378] sm:$0xff] %v504_v21  ;;  %v381_v30 = vand.u32 2147483647, %v253_v23  ;;  %v382_v31 = vand.u32 2147483647, %v254_v24  ;;  %633 = vst [vmem:[%s1036_s17 + $0x380] sm:$0xff] %v505_v25 }
  0x9a   : > { %v383_v32 = vand.u32 2147483647, %v255_v29  ;;  %634 = vst [vmem:[%s1036_s17 + $0x388] sm:$0xff] %v506_v26  ;;  %635 = vst [vmem:[%s1036_s17 + $0x390] sm:$0xff] %v507_v27  ;;  %v508_v33 = vsub.f32 0.0, %v380_v28  ;;  %v257_v35 = vld [vmem:[%s1023_s30 + $0x3c0] sm:$0xff] }
  0x9b   : > { %v258_v36 = vld [vmem:[%s1023_s30 + $0x3c8] sm:$0xff]  ;;  %v509_v37 = vsub.f32 0.0, %v381_v30  ;;  %v510_v38 = vsub.f32 0.0, %v382_v31  ;;  %v384_v40 = vand.u32 2147483647, %v256_v34  ;;  %v259_v41 = vld [vmem:[%s1023_s30 + $0x3d0] sm:$0xff] }
  0x9c   : > { %v511_v39 = vsub.f32 0.0, %v383_v32  ;;  %636 = vst [vmem:[%s1036_s17 + $0x398] sm:$0xff] %v508_v33  ;;  %v385_v42 = vand.u32 2147483647, %v257_v35  ;;  %v386_v43 = vand.u32 2147483647, %v258_v36 }
  0x9d   : > { %v387_v44 = vand.u32 2147483647, %v259_v41  ;;  %637 = vst [vmem:[%s1036_s17 + $0x3a0] sm:$0xff] %v509_v37  ;;  %638 = vst [vmem:[%s1036_s17 + $0x3a8] sm:$0xff] %v510_v38  ;;  %v512_v45 = vsub.f32 0.0, %v384_v40  ;;  %v260_v46 = vld [vmem:[%s1023_s30 + $0x3d8] sm:$0xff] }
  0x9e   : > { %639 = vst [vmem:[%s1036_s17 + $0x3b0] sm:$0xff] %v511_v39  ;;  %v261_v47 = vld [vmem:[%s1023_s30 + $0x3e0] sm:$0xff]  ;;  %v262_v48 = vld [vmem:[%s1023_s30 + $0x3e8] sm:$0xff]  ;;  %v513_v49 = vsub.f32 0.0, %v385_v42  ;;  %v514_v50 = vsub.f32 0.0, %v386_v43  ;;  %v263_v53 = vld [vmem:[%s1023_s30 + $0x3f0] sm:$0xff] }
  0x9f   : > { %v515_v51 = vsub.f32 0.0, %v387_v44  ;;  %v388_v52 = vand.u32 2147483647, %v260_v46  ;;  %640 = vst [vmem:[%s1036_s17 + $0x3b8] sm:$0xff] %v512_v45  ;;  %v389_v54 = vand.u32 2147483647, %v261_v47 }
  0xa0   : > { %v390_v55 = vand.u32 2147483647, %v262_v48  ;;  %v391_v56 = vand.u32 2147483647, %v263_v53  ;;  %641 = vst [vmem:[%s1036_s17 + $0x3c0] sm:$0xff] %v513_v49  ;;  %642 = vst [vmem:[%s1036_s17 + $0x3c8] sm:$0xff] %v514_v50 }
  0xa1   : > { %643 = vst [vmem:[%s1036_s17 + $0x3d0] sm:$0xff] %v515_v51  ;;  %v516_v57 = vsub.f32 0.0, %v388_v52  ;;  %v264_v58 = vld [vmem:[%s1023_s30 + $0x3f8] sm:$0xff]  ;;  %v517_v59 = vsub.f32 0.0, %v389_v54  ;;  %s650_s2 = scalar_lea.sflag [#allocation4], %s1019_s23  ;;  %s832_s3 = scalar_lea.vmem %s1290_s27, 16384 }
  0xa2   : > { %v518_v60 = vsub.f32 0.0, %v390_v55  ;;  %v519_v61 = vsub.f32 0.0, %v391_v56  ;;  %v392_v62 = vand.u32 2147483647, %v264_v58  ;;  %p833_p6 = scmp.ne.s32.totalorder %s1290_s27, %s832_s3  ;;  %p1345_p10 = scmp.ne.s32.totalorder %s1342_s18, 0 }
  0xa3   : > { %644 = vst [vmem:[%s1036_s17 + $0x3d8] sm:$0xff] %v516_v57  ;;  %645 = vst [vmem:[%s1036_s17 + $0x3e0] sm:$0xff] %v517_v59  ;;  %s903_s4 = smov [#allocation5]  }
  0xa4   : > { %646 = vst [vmem:[%s1036_s17 + $0x3e8] sm:$0xff] %v518_v60  ;;  %647 = vst [vmem:[%s1036_s17 + $0x3f0] sm:$0xff] %v519_v61  ;;  %v520_v63 = vsub.f32 0.0, %v392_v62  ;;  %p834_p11 = pnand %p833_p6, %p1345_p10  ;;  %s836_s5 = sshll.u32 %s903_s4, 4  ;;  %s837_s5 = int_to_ptr.vmem [resolvable:$false] %s836_s5 }
  0xa5   : > { %s838_s11 = scalar_lea.vmem %s837_s5, 32768  ;;  %p839_p8 = scmp.lt.s32.totalorder %s1290_s27, %s837_s5 }
  0xa6   : > { %648 = vst [vmem:[%s1036_s17 + $0x3f8] sm:$0xff] %v520_v63  ;;  %p835_p12 = pneg %p834_p11  ;;  %p840_p9 = scmp.lt.s32.totalorder %s838_s11, %s832_s3 }
  0xa8   : > { %p841_p13 = por %p840_p9, %p839_p8 }
  0xaa   : > { %p842_p1 = pnand %p841_p13, %p835_p12 }
  0xac   : > { %845 = shalt.err (!%p842_p1)
}
  0xad   : > { %s846_s13 = scalar_lea.hbm %s1288_s29, 16384  ;;  %s850_s20 = scalar_lea.hbm %s1338_s1, 65536 }
  0xae   : > { %p847_p3 = scmp.ne.s32.totalorder %s1288_s29, %s846_s13  ;;  %p851_p0 = scmp.lt.u32.totalorder %s1288_s29, %s1338_s1 }
  0xaf   : > { %p852_p2 = scmp.lt.u32.totalorder %s850_s20, %s846_s13  ;;  %p854_p6 = scmp.lt.u32.totalorder %s846_s13, %s1288_s29 }
  0xb0   : > { %p848_p4 = pnand %p847_p3, %p1345_p10 }
  0xb1   : > { %p853_p7 = por %p852_p2, %p851_p0 }
  0xb2   : > { %p849_p5 = pneg %p848_p4 }
  0xb3   : > { %p855_p11 = por %p854_p6, %p853_p7 }
  0xb5   : > { %p856_p12 = pnand %p855_p11, %p849_p5 }
  0xb7   : > { %859 = shalt.err (!%p856_p12)
}
  0xb8   : > { %s904_s24 = smov 128   ;;  %s905_s26 = smov 8  }
  0xb9   : > { %754 = dma.vmem_to_hbm [thread:$0]  (%p1345_p10), %s1290_s27, 16384, %s1288_s29, %s650_s2, %s904_s24, %s904_s24, %s905_s26  }
  0xba PF: > { %p765_p8 = scmp.ge.s32.totalorder %s898_s9, 2  ;;  %s678_s30 = sand.u32 1, %s886_s6  }
  0xbb   : > { %p1346_p9 = scmp.ne.s32.totalorder %s1343_s19, 0  ;;  %s679_s17 = scalar_lea.sflag [#allocation4], %s678_s30 }
  0xbd   : > { %p761_p13 = pnand %p765_p8, %p1346_p9 }
  0xbf   : > { %881 = dma.done.wait (!%p761_p13), %s679_s17, 16384  }
  0xc0   : > { %883 = vsyncadd (!%p761_p13), %s679_s17, 4294950912  ;;  %p14_p1 = scmp.ge.s32.totalorder %s941_s12, 6   ;;  %s1347_s6 = smov %s890_s7 }
  0xc1   : > { %s1348_s7 = smov %s894_s8  ;;  %s1349_s8 = smov %s953_s15 }
  0xc2   : > { %s1350_s9 = smov %s941_s12  ;;  %16 = sbr.rel (!%p14_p1) target bundleno = 5 (0x5), region = 69 }
  0xc9   :  { %684 = vsyncpa [#allocation3], 1 }
  0xca   :  { %686 = vsyncpa [#allocation3 + $0x1], 1 }
  0xcb   :  { %687 = vsyncpa [#allocation4], 1 }
  0xcc   :  { %689 = vsyncpa [#allocation4 + $0x1], 1 }

</bundles_post_ra>
